<compile_context>
chip_gen: v6e
topology: v6e:2x2x1
jax: 0.10.0
libtpu: 0.0.40
codegen_flags: <defaults>
</compile_context>

<pallas_src>
import functools
import math

import jax
import jax.numpy as jnp
from jax.experimental import pallas as pl
from jax.experimental.pallas import tpu as pltpu


_GELU_C = math.sqrt(2.0 / math.pi)


def _gelu_tanh(x):
    # tanh-approximate GELU (tanh lowers to the EUP; math kept in f32).
    # TODO(synk): PyTorch nn.GELU() defaults to the exact erf form; Mosaic has no erf
    # lowering, so the tanh approximation (<1e-3 abs error) is used in kernel and ref.
    return 0.5 * x * (1.0 + jnp.tanh(_GELU_C * (x + 0.044715 * (x * x * x))))


def _deconv_bn_act_kernel(apply_act, x_ref, w_ref, scale_ref, shift_ref, o_ref):
    # (row_tile, c1) @ (c1, 4*c2) on the MXU, f32 accumulation; no operand upcast.
    h = jnp.dot(x_ref[...], w_ref[...], preferred_element_type=jnp.float32)
    # Fused conv-bias + inference BatchNorm as per-column scale/shift (f32, VPU).
    h = h * scale_ref[...] + shift_ref[...]
    if apply_act:
        h = _gelu_tanh(h)
    o_ref[...] = h.astype(o_ref.dtype)


def deconv_bn_gelu_pallas(x, w, b, gamma, beta, running_mean, running_var,
                          *, eps=1e-5, act=True, row_tile=256):
    """DeConv.forward: GELU(BN(ConvTranspose2d(x)))  (inference-mode BatchNorm).

    x: (N, c1, H, W)   w: (c1, c2, 2, 2)  [torch ConvTranspose2d layout]   b: (c2,)
    gamma/beta/running_mean/running_var: (c2,)
    returns: (N, c2, 2H, 2W)
    """
    # TODO(synk): training-mode BatchNorm (batch statistics) is not implemented; this
    # uses running statistics (eval mode), the standard inference semantics.
    n, c1, hh, ww = x.shape
    c2 = w.shape[1]
    co = 4 * c2
    rows = n * hh * ww

    # Fold conv bias + BN into per-channel scale/shift (kept in f32).
    scale = (gamma / jnp.sqrt(running_var + eps)).astype(jnp.float32)        # (c2,)
    shift = (beta + scale * (b - running_mean)).astype(jnp.float32)          # (c2,)

    # Weight matrix with columns ordered (di, dj, o): (c1, c2, 2, 2) -> (c1, 4*c2).
    w_mat = jnp.transpose(w, (0, 2, 3, 1)).reshape(c1, co)
    scale_cols = jnp.tile(scale, 4).reshape(1, co)
    shift_cols = jnp.tile(shift, 4).reshape(1, co)

    # Pixels-as-rows (NHWC flatten) so the kernel's output tile is lane-dense (4*c2).
    x_rows = jnp.transpose(x, (0, 2, 3, 1)).reshape(rows, c1)

    # ---- Row-tile selection --------------------------------------------------------
    itemsize = x.dtype.itemsize
    row_tile = max(8, (int(row_tile) // 8) * 8)
    # Keep double-buffered x/out tiles + resident weights well inside the default
    # scoped VMEM on every generation (incl. v7x: 32 MiB scoped of 64 MiB physical).
    vmem_budget = 16 * 1024 * 1024
    const_bytes = 2 * (w_mat.size * w_mat.dtype.itemsize + 2 * co * 4)
    per_row_bytes = 2 * (c1 + co) * itemsize
    max_rows_vmem = max(8, ((vmem_budget - const_bytes) // per_row_bytes) // 8 * 8)
    row_tile = min(row_tile, max_rows_vmem)
    # Never make the block bigger than the array; keep >= 2 grid steps when possible
    # so the 'parallel' grid axis can shard across v7x's two TensorCores.
    row_tile = min(row_tile, ((rows + 7) // 8) * 8)
    if rows >= 16:
        row_tile = min(row_tile, ((pl.cdiv(rows, 2) + 7) // 8) * 8)

    grid = (pl.cdiv(rows, row_tile),)   # ragged last block handled by Pallas; no padding

    kernel = functools.partial(_deconv_bn_act_kernel, bool(act))

    flops = 2 * rows * c1 * co + 2 * rows * co
    transcendentals = rows * co if act else 0
    bytes_accessed = (x_rows.size * itemsize + w_mat.size * w_mat.dtype.itemsize
                      + 2 * co * 4 + rows * co * itemsize)

    y = pl.pallas_call(
        kernel,
        out_shape=jax.ShapeDtypeStruct((rows, co), x.dtype),
        grid_spec=pltpu.PrefetchScalarGridSpec(
            num_scalar_prefetch=0,
            grid=grid,
            in_specs=[
                pl.BlockSpec((row_tile, c1), lambda i: (i, 0)),   # x row tile
                pl.BlockSpec((c1, co), lambda i: (0, 0)),         # full weight (resident)
                pl.BlockSpec((1, co), lambda i: (0, 0)),          # per-column scale
                pl.BlockSpec((1, co), lambda i: (0, 0)),          # per-column shift
            ],
            out_specs=pl.BlockSpec((row_tile, co), lambda i: (i, 0)),
        ),
        compiler_params=pltpu.CompilerParams(
            dimension_semantics=("parallel",),
        ),
        cost_estimate=pl.CostEstimate(
            flops=int(flops),
            transcendentals=int(transcendentals),
            bytes_accessed=int(bytes_accessed),
        ),
    )(x_rows, w_mat, scale_cols, shift_cols)

    # (rows, (di, dj, o)) -> (N, c2, 2H, 2W): depth-to-space + NHWC->NCHW in the wrapper.
    y = y.reshape(n, hh, ww, 2, 2, c2)
    y = jnp.transpose(y, (0, 5, 1, 3, 2, 4)).reshape(n, c2, 2 * hh, 2 * ww)
    return y


def deconv_bn_gelu_reference(x, w, b, gamma, beta, mean, var, eps=1e-5, act=True):
    """Pure-JAX reference matching the PyTorch forward (eval-mode BN, tanh GELU)."""
    n, c1, hh, ww = x.shape
    c2 = w.shape[1]
    # ConvTranspose2d(k=2, s=2, p=0): out[n,o,2h+d,2w+k] = sum_c x[n,c,h,w] * W[c,o,d,k]
    y = jnp.einsum('nchw,codk->nohdwk', x, w, precision=jax.lax.Precision.HIGHEST)
    y = y.reshape(n, c2, 2 * hh, 2 * ww) + b[None, :, None, None]
    s = (gamma / jnp.sqrt(var + eps))[None, :, None, None]
    y = (y - mean[None, :, None, None]) * s + beta[None, :, None, None]
    if act:
        y = _gelu_tanh(y)
    return y


if __name__ == "__main__":
    key = jax.random.PRNGKey(0)

    # Small shapes consistent with DeConv(c1, c2): NCHW input, 2x spatial upsample.
    n, c1, c2, hh, ww = 2, 32, 32, 16, 16   # -> 512 pixel rows, 4*c2 = 128 lane-dense cols

    kx, kw, kb, kg, kbt, km, kv = jax.random.split(key, 7)
    x = jax.random.normal(kx, (n, c1, hh, ww), jnp.float32)
    bound = 1.0 / math.sqrt(c1 * 2 * 2)
    w = jax.random.uniform(kw, (c1, c2, 2, 2), jnp.float32, -bound, bound)   # torch (in,out,kH,kW)
    b = jax.random.uniform(kb, (c2,), jnp.float32, -bound, bound)
    gamma = jax.random.uniform(kg, (c2,), jnp.float32, 0.5, 1.5)
    beta = 0.1 * jax.random.normal(kbt, (c2,), jnp.float32)
    running_mean = 0.1 * jax.random.normal(km, (c2,), jnp.float32)
    running_var = jax.random.uniform(kv, (c2,), jnp.float32, 0.5, 1.5)

    out = deconv_bn_gelu_pallas(x, w, b, gamma, beta, running_mean, running_var)
    out = jax.block_until_ready(out)

    ref = deconv_bn_gelu_reference(x, w, b, gamma, beta, running_mean, running_var)
    assert out.shape == (n, c2, 2 * hh, 2 * ww), out.shape
    max_err = float(jnp.max(jnp.abs(out - ref)))
    assert jnp.allclose(out, ref, atol=1e-4, rtol=1e-4), max_err

    print("KERNEL_OK")
</pallas_src>

<mosaic_0001>
module attributes {stable_mosaic.version = 11 : i64} {
  func.func @_deconv_bn_act_kernel(%arg0: i32, %arg1: memref<256x32xf32, #tpu.memory_space<vmem>>, %arg2: memref<32x128xf32, #tpu.memory_space<vmem>>, %arg3: memref<1x128xf32, #tpu.memory_space<vmem>>, %arg4: memref<1x128xf32, #tpu.memory_space<vmem>>, %arg5: memref<256x128xf32, #tpu.memory_space<vmem>>) attributes {dimension_semantics = [#tpu.dimension_semantics<parallel>], iteration_bounds = array<i64: 2>, scalar_prefetch = 0 : i64, scratch_operands = 0 : i64, tpu.core_type = #tpu.core_type<tc>, window_params = [{transform_indices = @transform_0, window_bounds = array<i64: 256, 32>}, {pipeline_mode = #tpu.pipeline_mode<synchronous>, transform_indices = @transform_1, window_bounds = array<i64: 32, 128>}, {pipeline_mode = #tpu.pipeline_mode<synchronous>, transform_indices = @transform_2, window_bounds = array<i64: 1, 128>}, {pipeline_mode = #tpu.pipeline_mode<synchronous>, transform_indices = @transform_3, window_bounds = array<i64: 1, 128>}, {transform_indices = @transform_4, window_bounds = array<i64: 256, 128>}]} {
    %c0 = arith.constant 0 : index
    %c0_0 = arith.constant 0 : index
    %0 = vector.load %arg1[%c0, %c0_0] : memref<256x32xf32, #tpu.memory_space<vmem>>, vector<256x32xf32>
    %c0_1 = arith.constant 0 : index
    %c0_2 = arith.constant 0 : index
    %1 = vector.load %arg2[%c0_1, %c0_2] : memref<32x128xf32, #tpu.memory_space<vmem>>, vector<32x128xf32>
    %cst = arith.constant dense<0.000000e+00> : vector<256x128xf32>
    %2 = tpu.matmul %0, %1, %cst {dimension_numbers = #tpu.dot_dimension_numbers<[1], [0], [0], [1], [0, 0, 1, 1], [], []>} : vector<256x32xf32>, vector<32x128xf32>, vector<256x128xf32> -> vector<256x128xf32>
    %c0_3 = arith.constant 0 : index
    %c0_4 = arith.constant 0 : index
    %3 = vector.load %arg3[%c0_3, %c0_4] : memref<1x128xf32, #tpu.memory_space<vmem>>, vector<1x128xf32>
    %4 = vector.broadcast %3 : vector<1x128xf32> to vector<256x128xf32>
    %5 = arith.mulf %2, %4 : vector<256x128xf32>
    %c0_5 = arith.constant 0 : index
    %c0_6 = arith.constant 0 : index
    %6 = vector.load %arg4[%c0_5, %c0_6] : memref<1x128xf32, #tpu.memory_space<vmem>>, vector<1x128xf32>
    %7 = vector.broadcast %6 : vector<1x128xf32> to vector<256x128xf32>
    %8 = arith.addf %5, %7 : vector<256x128xf32>
    %cst_7 = arith.constant 5.000000e-01 : f32
    %9 = vector.broadcast %cst_7 : f32 to vector<256x128xf32>
    %10 = arith.mulf %9, %8 : vector<256x128xf32>
    %11 = arith.mulf %8, %8 : vector<256x128xf32>
    %12 = arith.mulf %11, %8 : vector<256x128xf32>
    %cst_8 = arith.constant 4.471500e-02 : f32
    %13 = vector.broadcast %cst_8 : f32 to vector<256x128xf32>
    %14 = arith.mulf %13, %12 : vector<256x128xf32>
    %15 = arith.addf %8, %14 : vector<256x128xf32>
    %cst_9 = arith.constant 0.797884583 : f32
    %16 = vector.broadcast %cst_9 : f32 to vector<256x128xf32>
    %17 = arith.mulf %16, %15 : vector<256x128xf32>
    %18 = math.tanh %17 : vector<256x128xf32>
    %cst_10 = arith.constant 1.000000e+00 : f32
    %19 = vector.broadcast %cst_10 : f32 to vector<256x128xf32>
    %20 = arith.addf %19, %18 : vector<256x128xf32>
    %21 = arith.mulf %10, %20 : vector<256x128xf32>
    %c0_11 = arith.constant 0 : index
    %c0_12 = arith.constant 0 : index
    %22 = vector.load %arg5[%c0_11, %c0_12] : memref<256x128xf32, #tpu.memory_space<vmem>>, vector<256x128xf32>
    tpu.vector_store %arg5[%c0_11, %c0_12], %21 {strides = array<i32>} : memref<256x128xf32, #tpu.memory_space<vmem>>, vector<256x128xf32>,
    return
  }
  func.func @transform_0(%arg0: i32) -> (i32, i32) {
    %c0_i32 = arith.constant 0 : i32
    %c0_i32_0 = arith.constant 0 : i32
    return %arg0, %c0_i32 : i32, i32
  }
  func.func @transform_1(%arg0: i32) -> (i32, i32) {
    %c0_i32 = arith.constant 0 : i32
    %c0_i32_0 = arith.constant 0 : i32
    %c0_i32_1 = arith.constant 0 : i32
    return %c0_i32, %c0_i32_0 : i32, i32
  }
  func.func @transform_2(%arg0: i32) -> (i32, i32) {
    %c0_i32 = arith.constant 0 : i32
    %c0_i32_0 = arith.constant 0 : i32
    %c0_i32_1 = arith.constant 0 : i32
    return %c0_i32, %c0_i32_0 : i32, i32
  }
  func.func @transform_3(%arg0: i32) -> (i32, i32) {
    %c0_i32 = arith.constant 0 : i32
    %c0_i32_0 = arith.constant 0 : i32
    %c0_i32_1 = arith.constant 0 : i32
    return %c0_i32, %c0_i32_0 : i32, i32
  }
  func.func @transform_4(%arg0: i32) -> (i32, i32) {
    %c0_i32 = arith.constant 0 : i32
    %c0_i32_0 = arith.constant 0 : i32
    return %arg0, %c0_i32 : i32, i32
  }
}

</mosaic_0001>

<bundles_post_ra>
// kernel: tpu_custom_call.1
= control target key start
LH: loop header
LB: loop body
LE: loop exit
PB: predicated region body
PF: predicated region fallthrough
CT: control target
= control target key end

     0   :  { %9 = vsyncpa [#allocation3], 0  ;;  %s1889_s0 = inlined_call_operand.vmem [shape: f32[512,32], index: 0, kind: input, shape index: {}]   ;;  %s1890_s1 = inlined_call_operand.vmem [shape: f32[32,128], index: 1, kind: input, shape index: {}]   ;;  %s1891_s2 = inlined_call_operand.vmem [shape: f32[1,128], index: 2, kind: input, shape index: {}]   ;;  %s1892_s3 = inlined_call_operand.vmem [shape: f32[1,128], index: 3, kind: input, shape index: {}]   ;;  %s1893_s4 = inlined_call_operand.hbm [shape: f32[512,128], index: 4, kind: output, shape index: {}]  }
   0x1   :  { %11 = vsyncpa [#allocation3 + $0x1], 0  ;;  %s1373_s15 = smov 0   ;;  %s1375_s16 = smov 0  }
   0x2   :  { %s1377_s17 = smov 0   ;;  %s1379_s18 = smov 0  }
   0x3 LB: > { %s1394_s19 = sadd.s32 4294967295, %s1343_s18   ;;  %s1031_s20 = sadd.s32 4294967294, %s1343_s18   ;;  %s1343_s18 = sphi %s1379_s18, %s1899_s18   ;;  %s1339_s17 = sphi %s1377_s17, %s1898_s17   ;;  %s1335_s16 = sphi %s1375_s16, %s1897_s16   ;;  %s1331_s15 = sphi %s1373_s15, %s1896_s15  }
   0x4   : > { %s1398_s21 = sadd.s32 1, %s1343_s18   ;;  %s113_s22 = sadd.s32 1, %s1339_s17 }
   0x5   : > { %s110_s23 = ssub.s32 %s1343_s18, %s1398_s21  ;;  %p123_p0 = scmp.ne.s32.totalorder %s1339_s17, %s1335_s16 }
   0x6   : > { %p111_p1 = scmp.eq.s32.totalorder %s110_s23, 0  ;;  %p124_p2 = scmp.eq.s32.totalorder %s1394_s19, 1 }
   0x7   : > { %p129_p3 = scmp.ne.s32.totalorder %s1335_s16, %s1331_s15  ;;  %p130_p4 = scmp.eq.s32.totalorder %s1031_s20, 1 }
   0x8   : > { %s1409_s24 = scalar_select %p111_p1, %s1339_s17, %s113_s22  }
   0x9   : > { %p1411_p5 = por %p124_p2, %p123_p0  ;;  %p1415_p6 = por %p130_p4, %p129_p3 }
   0xa   : > { %p1034_p7 = scmp.ge.s32.totalorder %s1343_s18, 1  ;;  %p166_p8 = scmp.lt.s32.totalorder %s1343_s18, 3 }
   0xc   : > { %p167_p9 = pnand %p1034_p7, %p166_p8 }
   0xd   : > { %s1036_s5 = sshll.u32 (!%p167_p9), %s1394_s19, 5  ;;  %s189_s27 = sand.u32 (!%p167_p9), 1, %s1335_s16  }
   0xe   : > { %170 = sbr.rel (%p167_p9) target bundleno = 343 (0x157), region = 36  ;;  %p193_p10 = scmp.lt.s32.totalorder (!%p167_p9), %s1036_s5, 63 }
   0xf   : > { %s1035_s28 = sshll.u32 (!%p167_p9), %s189_s27, 8  ;;  %s1077_s30 = sshll.u32 (!%p167_p9), %s1394_s19, 12 }
  0x10   : > { %s1632_s29 = scalar_lea.vmem (!%p167_p9), [#allocation2], %s1035_s28  ;;  %s1841_s8 = scalar_lea.hbm (!%p167_p9), %s1893_s4, %s1077_s30 }
  0x11   : > { %s1849_s19 = scalar_lea.sflag (!%p167_p9), [#allocation3], %s189_s27 }
  0x13   : > { %v234_v0 = vld [vmem:[%s1890_s1 + $0x18] sm:$0xff]  ;;  %v233_v1 = vld [vmem:[%s1890_s1 + $0x10] sm:$0xff]  ;;  %v232_v2 = vld [vmem:[%s1890_s1 + $0x8] sm:$0xff]  ;;  %s1901_s5 = smov (!%p193_p10, %s1036_s5), 63  ;;  %vm235_vm0 = vcmask 261120  }
  0x14   : > { %1114 = vmatprep.subr.mxu0 %v234_v0  ;;  %1170 = vmatprep.subr.mxu1 %v234_v0  ;;  %v231_v3 = vld [vmem:[%s1890_s1] sm:$0xff]  ;;  %s1037_s10 = sshll.u32 %s1901_s5, 3  ;;  %s969_s5 = sshll.u32 %s1632_s29, 4  ;;  %s1843_s5 = int_to_ptr.vmem [resolvable:$true] %s969_s5 }
  0x15   : > { %1115 = vmatpush3.msra.mxu0 %v234_v0  ;;  %1174 = vmatpush3.msra.mxu1 %v234_v0  ;;  %s1437_s13 = scalar_lea.vmem %s1889_s0, %s1037_s10  ;;  %v1506_v36 = vld [vmem:[%s1891_s2] ss:$0 sm:$0xff]  ;;  %s1283_s9 = scalar_lea.vmem %s1843_s5, 4096 }
  0x16   : > { %1116 = vmatprep.subr.mxu0 %v233_v1  ;;  %1171 = vmatprep.subr.mxu1 %v233_v1  ;;  %v199_v4 = vld [vmem:[%s1437_s13] sm:$0xff]  ;;  %v200_v6 = vld [vmem:[%s1437_s13 + $0x8] sm:$0xff]  ;;  %v201_v8 = vld [vmem:[%s1437_s13 + $0x10] sm:$0xff]  ;;  %p1284_p11 = scmp.ne.s32.totalorder %s1843_s5, %s1283_s9  ;;  %s1345_s10 = smov [#allocation2]  }
  0x17   : > { %1117 = vmatpush3.msra.mxu0 %v233_v1  ;;  %1175 = vmatpush3.msra.mxu1 %v233_v1  ;;  %v215_v5 = vld [vmem:[%s1437_s13 + $0x80] sm:$0xff]  ;;  %v216_v7 = vld [vmem:[%s1437_s13 + $0x88] sm:$0xff]  ;;  %v217_v9 = vld [vmem:[%s1437_s13 + $0x90] sm:$0xff]  ;;  %s1287_s11 = sshll.u32 %s1345_s10, 4  ;;  %s1288_s11 = int_to_ptr.vmem [resolvable:$false] %s1287_s11 }
  0x18   : > { %1118 = vmatprep.subr.mxu0 %v232_v2  ;;  %1172 = vmatprep.subr.mxu1 %v232_v2  ;;  %v202_v10 = vld [vmem:[%s1437_s13 + $0x18] sm:$0xff]  ;;  %v203_v12 = vld [vmem:[%s1437_s13 + $0x20] sm:$0xff]  ;;  %v204_v14 = vld [vmem:[%s1437_s13 + $0x28] sm:$0xff]  ;;  %p1285_p12 = pnand %p1284_p11, %p1411_p5  ;;  %s1289_s12 = scalar_lea.vmem %s1288_s11, 8192 }
  0x19   : > { %1119 = vmatpush3.msra.mxu0 %v232_v2  ;;  %1176 = vmatpush3.msra.mxu1 %v232_v2  ;;  %v218_v11 = vld [vmem:[%s1437_s13 + $0x98] sm:$0xff]  ;;  %v219_v13 = vld [vmem:[%s1437_s13 + $0xa0] sm:$0xff]  ;;  %v220_v15 = vld [vmem:[%s1437_s13 + $0xa8] sm:$0xff]  ;;  %p1290_p0 = scmp.lt.s32.totalorder %s1843_s5, %s1288_s11  ;;  %p1291_p1 = scmp.lt.s32.totalorder %s1289_s12, %s1283_s9 }
  0x1a   : > { %1120 = vmatprep.subr.mxu0 %v231_v3  ;;  %1173 = vmatprep.subr.mxu1 %v231_v3  ;;  %v205_v16 = vld [vmem:[%s1437_s13 + $0x30] sm:$0xff]  ;;  %v206_v18 = vld [vmem:[%s1437_s13 + $0x38] sm:$0xff]  ;;  %v207_v20 = vld [vmem:[%s1437_s13 + $0x40] sm:$0xff]  ;;  %p1286_p13 = pneg %p1285_p12 }
  0x1b   : > { %1121 = vmatpush3.msra.mxu0 %v231_v3  ;;  %1177 = vmatpush3.msra.mxu1 %v231_v3  ;;  %v221_v17 = vld [vmem:[%s1437_s13 + $0xb0] sm:$0xff]  ;;  %v222_v19 = vld [vmem:[%s1437_s13 + $0xb8] sm:$0xff]  ;;  %v223_v21 = vld [vmem:[%s1437_s13 + $0xc0] sm:$0xff]  ;;  %p1292_p2 = por %p1291_p1, %p1290_p0 }
  0x1c   : > { %1122 = vmatprep.mubr.msk.f32.mxu0 %vm235_vm0, %v199_v4  ;;  %1146 = vmatprep.mubr.msk.f32.mxu1 %vm235_vm0, %v215_v5  ;;  %v208_v22 = vld [vmem:[%s1437_s13 + $0x48] sm:$0xff]  ;;  %v209_v24 = vld [vmem:[%s1437_s13 + $0x50] sm:$0xff]  ;;  %v210_v26 = vld [vmem:[%s1437_s13 + $0x58] sm:$0xff] }
  0x1d   : > { %1123 = vmatmul.mubr.msk.f32.vlgmr.msra.gmra.mxu0 %vm235_vm0, %v200_v6  ;;  %1147 = vmatmul.mubr.msk.f32.vlgmr.msra.gmra.mxu1 %vm235_vm0, %v216_v7  ;;  %v224_v23 = vld [vmem:[%s1437_s13 + $0xc8] sm:$0xff]  ;;  %v225_v25 = vld [vmem:[%s1437_s13 + $0xd0] sm:$0xff]  ;;  %v226_v27 = vld [vmem:[%s1437_s13 + $0xd8] sm:$0xff]  ;;  %p1293_p3 = pnand %p1292_p2, %p1286_p13 }
  0x1e   : > { %1125 = vmatprep.mubr.msk.f32.mxu0 %vm235_vm0, %v201_v8  ;;  %1149 = vmatprep.mubr.msk.f32.mxu1 %vm235_vm0, %v217_v9  ;;  %v211_v28 = vld [vmem:[%s1437_s13 + $0x60] sm:$0xff]  ;;  %v212_v30 = vld [vmem:[%s1437_s13 + $0x68] sm:$0xff]  ;;  %v213_v32 = vld [vmem:[%s1437_s13 + $0x70] sm:$0xff] }
  0x1f   : > { %v227_v29 = vld [vmem:[%s1437_s13 + $0xe0] sm:$0xff]  ;;  %v228_v31 = vld [vmem:[%s1437_s13 + $0xe8] sm:$0xff]  ;;  %v229_v33 = vld [vmem:[%s1437_s13 + $0xf0] sm:$0xff] }
  0x20   : > { %v214_v34 = vld [vmem:[%s1437_s13 + $0x78] sm:$0xff]  ;;  %v1511_v38 = vld [vmem:[%s1892_s3] ss:$0 sm:$0xff] }
  0x21   : > { %1126 = vmatmul.mubr.msk.f32.gmra.mxu0 %vm235_vm0, %v202_v10  ;;  %1150 = vmatmul.mubr.msk.f32.gmra.mxu1 %vm235_vm0, %v218_v11  ;;  %v230_v35 = vld [vmem:[%s1437_s13 + $0xf8] sm:$0xff] }
  0x22   : > { %1128 = vmatprep.mubr.msk.f32.mxu0 %vm235_vm0, %v203_v12  ;;  %1152 = vmatprep.mubr.msk.f32.mxu1 %vm235_vm0, %v219_v13 }
  0x25   : > { %1129 = vmatmul.mubr.msk.f32.gmra.mxu0 %vm235_vm0, %v204_v14  ;;  %1153 = vmatmul.mubr.msk.f32.gmra.mxu1 %vm235_vm0, %v220_v15 }
  0x26   : > { %1131 = vmatprep.mubr.msk.f32.mxu0 %vm235_vm0, %v205_v16  ;;  %1155 = vmatprep.mubr.msk.f32.mxu1 %vm235_vm0, %v221_v17 }
  0x29   : > { %1132 = vmatmul.mubr.msk.f32.gmra.mxu0 %vm235_vm0, %v206_v18  ;;  %1156 = vmatmul.mubr.msk.f32.gmra.mxu1 %vm235_vm0, %v222_v19 }
  0x2a   : > { %1134 = vmatprep.mubr.msk.f32.mxu0 %vm235_vm0, %v207_v20  ;;  %1158 = vmatprep.mubr.msk.f32.mxu1 %vm235_vm0, %v223_v21 }
  0x2d   : > { %1135 = vmatmul.mubr.msk.f32.gmra.mxu0 %vm235_vm0, %v208_v22  ;;  %1159 = vmatmul.mubr.msk.f32.gmra.mxu1 %vm235_vm0, %v224_v23 }
  0x2e   : > { %1137 = vmatprep.mubr.msk.f32.mxu0 %vm235_vm0, %v209_v24  ;;  %1161 = vmatprep.mubr.msk.f32.mxu1 %vm235_vm0, %v225_v25 }
  0x31   : > { %1138 = vmatmul.mubr.msk.f32.gmra.mxu0 %vm235_vm0, %v210_v26  ;;  %1162 = vmatmul.mubr.msk.f32.gmra.mxu1 %vm235_vm0, %v226_v27 }
  0x32   : > { %1140 = vmatprep.mubr.msk.f32.mxu0 %vm235_vm0, %v211_v28  ;;  %1164 = vmatprep.mubr.msk.f32.mxu1 %vm235_vm0, %v227_v29 }
  0x35   : > { %1141 = vmatmul.mubr.msk.f32.gmra.mxu0 %vm235_vm0, %v212_v30  ;;  %1165 = vmatmul.mubr.msk.f32.gmra.mxu1 %vm235_vm0, %v228_v31 }
  0x36   : > { %1143 = vmatprep.mubr.msk.f32.mxu0 %vm235_vm0, %v213_v32  ;;  %1167 = vmatprep.mubr.msk.f32.mxu1 %vm235_vm0, %v229_v33 }
  0x39   : > { %1144 = vmatmul.mubr.msk.f32.gmra.mxu0 %vm235_vm0, %v214_v34  ;;  %1168 = vmatmul.mubr.msk.f32.gmra.mxu1 %vm235_vm0, %v230_v35 }
  0xdd   : > { %v1124_v37 = vpop.f32.mrf.mxu0  ;;  %v1148_v39 = vpop.f32.mrf.mxu1 }
  0xde   : > { %v565_v40 = vmul.f32 %v1124_v37, %v1506_v36  ;;  %v581_v41 = vmul.f32 %v1148_v39, %v1506_v36 }
  0xdf   : > { %v398_v42 = vpop.f32.mrf.mxu0  ;;  %v478_v43 = vpop.f32.mrf.mxu1 }
  0xe0   : > { %v1516_v44 = vadd.f32 %v1511_v38, %v565_v40  ;;  %v1519_v45 = vadd.f32 %v1511_v38, %v581_v41  ;;  %v564_v46 = vmul.f32 %v1506_v36, %v398_v42  ;;  %v580_v47 = vmul.f32 %v1506_v36, %v478_v43 }
  0xe1   : > { %v1127_v48 = vpop.f32.mrf.mxu0  ;;  %v1151_v49 = vpop.f32.mrf.mxu1 }
  0xe2   : > { %v668_v50 = vmul.f32 %v1516_v44, %v1516_v44  ;;  %v684_v51 = vmul.f32 %v1519_v45, %v1519_v45  ;;  %v1528_v52 = vadd.f32 %v1511_v38, %v564_v46  ;;  %v1531_v53 = vadd.f32 %v1511_v38, %v580_v47 }
  0xe3   : > { %v567_v54 = vmul.f32 %v1127_v48, %v1506_v36  ;;  %v583_v55 = vmul.f32 %v1151_v49, %v1506_v36  ;;  %v408_v56 = vpop.f32.mrf.mxu0  ;;  %v488_v57 = vpop.f32.mrf.mxu1 }
  0xe4   : > { %v700_v58 = vmul.f32 %v668_v50, %v1516_v44  ;;  %v716_v59 = vmul.f32 %v684_v51, %v1519_v45  ;;  %v566_v60 = vmul.f32 %v1506_v36, %v408_v56  ;;  %v582_v61 = vmul.f32 %v1506_v36, %v488_v57 }
  0xe5   : > { %v667_v62 = vmul.f32 %v1528_v52, %v1528_v52  ;;  %v683_v63 = vmul.f32 %v1531_v53, %v1531_v53  ;;  %v1544_v2 = vadd.f32 %v1511_v38, %v567_v54  ;;  %v1547_v3 = vadd.f32 %v1511_v38, %v583_v55  ;;  %v1130_v7 = vpop.f32.mrf.mxu0  ;;  %v1154_v22 = vpop.f32.mrf.mxu1 }
  0xe6   : > { %v732_v0 = vmul.f32 0.044715, %v700_v58  ;;  %v748_v1 = vmul.f32 0.044715, %v716_v59  ;;  %v1552_v6 = vadd.f32 %v1511_v38, %v566_v60  ;;  %v1559_v11 = vadd.f32 %v1511_v38, %v582_v61 }
  0xe7   : > { %v699_v4 = vmul.f32 %v667_v62, %v1528_v52  ;;  %v715_v5 = vmul.f32 %v683_v63, %v1531_v53  ;;  %v670_v10 = vmul.f32 %v1544_v2, %v1544_v2  ;;  %v686_v14 = vmul.f32 %v1547_v3, %v1547_v3  ;;  %v418_v23 = vpop.f32.mrf.mxu0  ;;  %v498_v37 = vpop.f32.mrf.mxu1 }
  0xe8   : > { %v764_v8 = vadd.f32 %v732_v0, %v1516_v44  ;;  %v780_v9 = vadd.f32 %v748_v1, %v1519_v45  ;;  %v669_v21 = vmul.f32 %v1552_v6, %v1552_v6  ;;  %v685_v25 = vmul.f32 %v1559_v11, %v1559_v11 }
  0xe9   : > { %v731_v12 = vmul.f32 0.044715, %v699_v4  ;;  %v747_v13 = vmul.f32 0.044715, %v715_v5  ;;  %v702_v17 = vmul.f32 %v670_v10, %v1544_v2  ;;  %v718_v20 = vmul.f32 %v686_v14, %v1547_v3  ;;  %v1133_v39 = vpop.f32.mrf.mxu0  ;;  %v1157_v57 = vpop.f32.mrf.mxu1 }
  0xea   : > { %v796_v15 = vmul.f32 0.7978846, %v764_v8  ;;  %v812_v16 = vmul.f32 0.7978846, %v780_v9  ;;  %v701_v30 = vmul.f32 %v669_v21, %v1552_v6  ;;  %v717_v31 = vmul.f32 %v685_v25, %v1559_v11 }
  0xeb   : > { %v763_v18 = vadd.f32 %v731_v12, %v1528_v52  ;;  %v779_v19 = vadd.f32 %v747_v13, %v1531_v53  ;;  %v734_v24 = vmul.f32 0.044715, %v702_v17  ;;  %v750_v28 = vmul.f32 0.044715, %v718_v20  ;;  %v428_v58 = vpop.f32.mrf.mxu0 }
  0xec   : > { %1219 = vtanh.f32 %v796_v15  ;;  %v569_v32 = vmul.f32 %v1130_v7, %v1506_v36  ;;  %v585_v34 = vmul.f32 %v1154_v22, %v1506_v36  ;;  %v568_v35 = vmul.f32 %v1506_v36, %v418_v23 }
  0xed   : > { %1221 = vtanh.f32 %v812_v16  ;;  %v795_v26 = vmul.f32 0.7978846, %v763_v18  ;;  %v811_v27 = vmul.f32 0.7978846, %v779_v19  ;;  %v766_v29 = vadd.f32 %v734_v24, %v1544_v2  ;;  %v508_v18 = vpop.f32.mrf.mxu1 }
  0xee   : > { %v782_v33 = vadd.f32 %v750_v28, %v1547_v3  ;;  %v733_v41 = vmul.f32 0.044715, %v701_v30  ;;  %v749_v42 = vmul.f32 0.044715, %v717_v31  ;;  %v1579_v46 = vadd.f32 %v1511_v38, %v569_v32 }
  0xef   : > { %1223 = vtanh.f32 %v795_v26  ;;  %v798_v40 = vmul.f32 0.7978846, %v766_v29  ;;  %v1582_v47 = vadd.f32 %v1511_v38, %v585_v34  ;;  %v1585_v48 = vadd.f32 %v1511_v38, %v568_v35 }
  0xf0   : > { %1225 = vtanh.f32 %v811_v27  ;;  %v814_v43 = vmul.f32 0.7978846, %v782_v33  ;;  %v765_v49 = vadd.f32 %v733_v41, %v1552_v6  ;;  %v781_v50 = vadd.f32 %v749_v42, %v1559_v11 }
  0xf1   : > { %1227 = vtanh.f32 %v798_v40  ;;  %v584_v51 = vmul.f32 %v1506_v36, %v498_v37  ;;  %v636_v54 = vmul.f32 0.5, %v1516_v44  ;;  %v652_v55 = vmul.f32 0.5, %v1519_v45 }
  0xf2   : > { %1229 = vtanh.f32 %v814_v43  ;;  %v672_v56 = vmul.f32 %v1579_v46, %v1579_v46  ;;  %v635_v59 = vmul.f32 0.5, %v1528_v52  ;;  %v797_v60 = vmul.f32 0.7978846, %v765_v49  ;;  %v1136_v49 = vpop.f32.mrf.mxu0 }
  0xf3   : > { %v813_v61 = vmul.f32 0.7978846, %v781_v50  ;;  %v688_v62 = vmul.f32 %v1582_v47, %v1582_v47  ;;  %v671_v44 = vmul.f32 %v1585_v48, %v1585_v48  ;;  %v1602_v45 = vadd.f32 %v1511_v38, %v584_v51 }
  0xf4   : > { %v704_v63 = vmul.f32 %v672_v56, %v1579_v46  ;;  %v571_v0 = vmul.f32 %v1133_v39, %v1506_v36  ;;  %1231 = vtanh.f32 %v797_v60  ;;  %v587_v1 = vmul.f32 %v1157_v57, %v1506_v36  ;;  %v1160_v60 = vpop.f32.mrf.mxu1 }
  0xf5   : > { %v720_v52 = vmul.f32 %v688_v62, %v1582_v47  ;;  %v570_v4 = vmul.f32 %v1506_v36, %v428_v58  ;;  %v651_v5 = vmul.f32 0.5, %v1531_v53  ;;  %1233 = vtanh.f32 %v813_v61 }
  0xf6   : > { %v736_v7 = vmul.f32 0.044715, %v704_v63  ;;  %v703_v8 = vmul.f32 %v671_v44, %v1585_v48  ;;  %v638_v9 = vmul.f32 0.5, %v1544_v2  ;;  %v687_v12 = vmul.f32 %v1602_v45, %v1602_v45 }
  0xf7   : > { %v752_v10 = vmul.f32 0.044715, %v720_v52  ;;  %v1616_v13 = vadd.f32 %v1511_v38, %v571_v0  ;;  %v654_v15 = vmul.f32 0.5, %v1547_v3  ;;  %v1621_v17 = vadd.f32 %v1511_v38, %v587_v1 }
  0xf8   : > { %v768_v53 = vadd.f32 %v736_v7, %v1579_v46  ;;  %v735_v16 = vmul.f32 0.044715, %v703_v8  ;;  %v719_v21 = vmul.f32 %v687_v12, %v1602_v45  ;;  %v1626_v22 = vadd.f32 %v1511_v38, %v570_v4 }
  0xf9   : > { %v1220_v14 = vpop.eup %1219  ;;  %v784_v2 = vadd.f32 %v752_v10, %v1582_v47  ;;  %v674_v25 = vmul.f32 %v1616_v13, %v1616_v13  ;;  %v586_v30 = vmul.f32 %v1506_v36, %v508_v18  ;;  %v637_v42 = vmul.f32 0.5, %v1552_v6 }
  0xfa   : > { %v1222_v19 = vpop.eup %1221  ;;  %v860_v20 = vadd.f32 1.0, %v1220_v14  ;;  %v800_v24 = vmul.f32 0.7978846, %v768_v53  ;;  %v767_v3 = vadd.f32 %v735_v16, %v1585_v48  ;;  %v751_v29 = vmul.f32 0.044715, %v719_v21  ;;  %v438_v53 = vpop.f32.mrf.mxu0 }
  0xfb   : > { %v876_v23 = vadd.f32 1.0, %v1222_v19  ;;  %v816_v28 = vmul.f32 0.7978846, %v784_v2  ;;  %v706_v39 = vmul.f32 %v674_v25, %v1616_v13  ;;  %v690_v43 = vmul.f32 %v1621_v17, %v1621_v17  ;;  %v518_v16 = vpop.f32.mrf.mxu1 }
  0xfc   : > { %v1224_v26 = vpop.eup %1223  ;;  %v892_v27 = vmul.f32 %v860_v20, %v636_v54  ;;  %1235 = vtanh.f32 %v800_v24  ;;  %v799_v34 = vmul.f32 0.7978846, %v767_v3  ;;  %v783_v37 = vadd.f32 %v751_v29, %v1602_v45 }
  0xfd   : > { %v1226_v31 = vpop.eup %1225  ;;  %v908_v32 = vmul.f32 %v876_v23, %v652_v55  ;;  %v859_v33 = vadd.f32 1.0, %v1224_v26  ;;  %1237 = vtanh.f32 %v816_v28  ;;  %v738_v56 = vmul.f32 0.044715, %v706_v39 }
  0xfe   : > { %924 = vst [vmem:[%s1632_s29 + $0x8] sm:$0xff] %v892_v27  ;;  %v875_v35 = vadd.f32 1.0, %v1226_v31  ;;  %v1228_v40 = vpop.eup %1227  ;;  %1239 = vtanh.f32 %v799_v34  ;;  %v815_v55 = vmul.f32 0.7978846, %v783_v37  ;;  %v722_v58 = vmul.f32 %v690_v43, %v1621_v17 }
  0xff   : > { %940 = vst [vmem:[%s1632_s29 + $0x88] sm:$0xff] %v908_v32  ;;  %v891_v41 = vmul.f32 %v859_v33, %v635_v59  ;;  %v1230_v50 = vpop.eup %1229  ;;  %v862_v54 = vadd.f32 1.0, %v1228_v40  ;;  %v673_v59 = vmul.f32 %v1626_v22, %v1626_v22  ;;  %v1646_v6 = vadd.f32 %v1511_v38, %v586_v30  ;;  %v1139_v30 = vpop.f32.mrf.mxu0 }
 0x100   : > { %v907_v51 = vmul.f32 %v875_v35, %v651_v5  ;;  %v878_v57 = vadd.f32 1.0, %v1230_v50  ;;  %1241 = vtanh.f32 %v815_v55  ;;  %v770_v62 = vadd.f32 %v738_v56, %v1616_v13  ;;  %v1163_v56 = vpop.f32.mrf.mxu1 }
 0x101   : > { %923 = vst [vmem:[%s1632_s29] sm:$0xff] %v891_v41  ;;  %v894_v61 = vmul.f32 %v862_v54, %v638_v9  ;;  %v573_v63 = vmul.f32 %v1136_v49, %v1506_v36  ;;  %v1232_v44 = vpop.eup %1231  ;;  %v653_v52 = vmul.f32 0.5, %v1559_v11  ;;  %v754_v1 = vmul.f32 0.044715, %v722_v58 }
 0x102   : > { %939 = vst [vmem:[%s1632_s29 + $0x80] sm:$0xff] %v907_v51  ;;  %v910_v0 = vmul.f32 %v878_v57, %v654_v15  ;;  %v705_v4 = vmul.f32 %v673_v59, %v1626_v22  ;;  %v1234_v5 = vpop.eup %1233  ;;  %v861_v7 = vadd.f32 1.0, %v1232_v44  ;;  %v802_v8 = vmul.f32 0.7978846, %v770_v62 }
 0x103   : > { %926 = vst [vmem:[%s1632_s29 + $0x18] sm:$0xff] %v894_v61  ;;  %v689_v10 = vmul.f32 %v1646_v6, %v1646_v6  ;;  %v1657_v9 = vadd.f32 %v1511_v38, %v573_v63  ;;  %v877_v12 = vadd.f32 1.0, %v1234_v5  ;;  %v786_v14 = vadd.f32 %v754_v1, %v1621_v17 }
 0x104   : > { %942 = vst [vmem:[%s1632_s29 + $0x98] sm:$0xff] %v910_v0  ;;  %v737_v15 = vmul.f32 0.044715, %v705_v4  ;;  %v589_v11 = vmul.f32 %v1160_v60, %v1506_v36  ;;  %v893_v18 = vmul.f32 %v861_v7, %v637_v42  ;;  %v640_v19 = vmul.f32 0.5, %v1579_v46  ;;  %v448_v60 = vpop.f32.mrf.mxu0 }
 0x105   : > { %1243 = vtanh.f32 %v802_v8  ;;  %v721_v20 = vmul.f32 %v689_v10, %v1646_v6  ;;  %v909_v2 = vmul.f32 %v877_v12, %v653_v52  ;;  %v818_v21 = vmul.f32 0.7978846, %v786_v14  ;;  %v528_v10 = vpop.f32.mrf.mxu1 }
 0x106   : > { %v769_v23 = vadd.f32 %v737_v15, %v1626_v22  ;;  %v676_v24 = vmul.f32 %v1657_v9, %v1657_v9  ;;  %925 = vst [vmem:[%s1632_s29 + $0x10] sm:$0xff] %v893_v18  ;;  %v1669_v25 = vadd.f32 %v1511_v38, %v589_v11  ;;  %v572_v26 = vmul.f32 %v1506_v36, %v438_v53 }
 0x107   : > { %v753_v3 = vmul.f32 0.044715, %v721_v20  ;;  %v588_v27 = vmul.f32 %v1506_v36, %v518_v16  ;;  %941 = vst [vmem:[%s1632_s29 + $0x90] sm:$0xff] %v909_v2  ;;  %v656_v46 = vmul.f32 0.5, %v1582_v47  ;;  %1245 = vtanh.f32 %v818_v21 }
 0x108   : > { %v801_v28 = vmul.f32 0.7978846, %v769_v23  ;;  %v708_v29 = vmul.f32 %v676_v24, %v1657_v9  ;;  %v639_v32 = vmul.f32 0.5, %v1585_v48  ;;  %v692_v34 = vmul.f32 %v1669_v25, %v1669_v25 }
 0x109   : > { %v1236_v31 = vpop.eup %1235  ;;  %v785_v33 = vadd.f32 %v753_v3, %v1646_v6  ;;  %v1681_v35 = vadd.f32 %v1511_v38, %v572_v26  ;;  %v1684_v40 = vadd.f32 %v1511_v38, %v588_v27  ;;  %v575_v49 = vmul.f32 %v1139_v30, %v1506_v36  ;;  %v1142_v27 = vpop.f32.mrf.mxu0 }
 0x10a   : > { %v1238_v37 = vpop.eup %1237  ;;  %v864_v39 = vadd.f32 1.0, %v1236_v31  ;;  %1247 = vtanh.f32 %v801_v28  ;;  %v740_v47 = vmul.f32 0.044715, %v708_v29  ;;  %v724_v48 = vmul.f32 %v692_v34, %v1669_v25 }
 0x10b   : > { %v1240_v41 = vpop.eup %1239  ;;  %v880_v42 = vadd.f32 1.0, %v1238_v37  ;;  %v817_v43 = vmul.f32 0.7978846, %v785_v33  ;;  %v675_v55 = vmul.f32 %v1681_v35, %v1681_v35  ;;  %v655_v58 = vmul.f32 0.5, %v1602_v45 }
 0x10c   : > { %v896_v50 = vmul.f32 %v864_v39, %v640_v19  ;;  %v863_v51 = vadd.f32 1.0, %v1240_v41  ;;  %v772_v54 = vadd.f32 %v740_v47, %v1657_v9  ;;  %v756_v59 = vmul.f32 0.044715, %v724_v48  ;;  %v1166_v41 = vpop.f32.mrf.mxu1 }
 0x10d   : > { %v912_v57 = vmul.f32 %v880_v42, %v656_v46  ;;  %1249 = vtanh.f32 %v817_v43  ;;  %v1242_v61 = vpop.eup %1241  ;;  %v707_v44 = vmul.f32 %v675_v55, %v1681_v35  ;;  %v691_v0 = vmul.f32 %v1684_v40, %v1684_v40  ;;  %v458_v55 = vpop.f32.mrf.mxu0 }
 0x10e   : > { %928 = vst [vmem:[%s1632_s29 + $0x28] sm:$0xff] %v896_v50  ;;  %v895_v62 = vmul.f32 %v863_v51, %v639_v32  ;;  %v804_v63 = vmul.f32 0.7978846, %v772_v54  ;;  %v879_v52 = vadd.f32 1.0, %v1242_v61  ;;  %v788_v1 = vadd.f32 %v756_v59, %v1669_v25 }
 0x10f   : > { %944 = vst [vmem:[%s1632_s29 + $0xa8] sm:$0xff] %v912_v57  ;;  %v1699_v4 = vadd.f32 %v1511_v38, %v575_v49  ;;  %v591_v45 = vmul.f32 %v1163_v56, %v1506_v36  ;;  %v739_v5 = vmul.f32 0.044715, %v707_v44  ;;  %v723_v7 = vmul.f32 %v691_v0, %v1684_v40 }
 0x110   : > { %927 = vst [vmem:[%s1632_s29 + $0x20] sm:$0xff] %v895_v62  ;;  %1251 = vtanh.f32 %v804_v63  ;;  %v574_v8 = vmul.f32 %v1506_v36, %v448_v60  ;;  %v911_v12 = vmul.f32 %v879_v52, %v655_v58  ;;  %v642_v14 = vmul.f32 0.5, %v1616_v13 }
 0x111   : > { %v820_v15 = vmul.f32 0.7978846, %v788_v1  ;;  %v678_v11 = vmul.f32 %v1699_v4, %v1699_v4  ;;  %v771_v16 = vadd.f32 %v739_v5, %v1681_v35  ;;  %v755_v18 = vmul.f32 0.044715, %v723_v7  ;;  %v538_v1 = vpop.f32.mrf.mxu1 }
 0x112   : > { %v1244_v53 = vpop.eup %1243  ;;  %v1710_v19 = vadd.f32 %v1511_v38, %v591_v45  ;;  %v1713_v20 = vadd.f32 %v1511_v38, %v574_v8  ;;  %943 = vst [vmem:[%s1632_s29 + $0xa0] sm:$0xff] %v911_v12  ;;  %v590_v13 = vmul.f32 %v1506_v36, %v528_v10  ;;  %v658_v23 = vmul.f32 0.5, %v1621_v17  ;;  %v1145_v12 = vpop.f32.mrf.mxu0 }
 0x113   : > { %v866_v2 = vadd.f32 1.0, %v1244_v53  ;;  %1253 = vtanh.f32 %v820_v15  ;;  %v710_v21 = vmul.f32 %v678_v11, %v1699_v4  ;;  %v803_v24 = vmul.f32 0.7978846, %v771_v16 }
 0x114   : > { %v787_v3 = vadd.f32 %v755_v18, %v1684_v40  ;;  %v694_v26 = vmul.f32 %v1710_v19, %v1710_v19  ;;  %v1246_v46 = vpop.eup %1245  ;;  %v641_v29 = vmul.f32 0.5, %v1626_v22  ;;  %v677_v31 = vmul.f32 %v1713_v20, %v1713_v20 }
 0x115   : > { %v898_v28 = vmul.f32 %v866_v2, %v642_v14  ;;  %v742_v30 = vmul.f32 0.044715, %v710_v21  ;;  %v882_v32 = vadd.f32 1.0, %v1246_v46  ;;  %1255 = vtanh.f32 %v803_v24 }
 0x116   : > { %v819_v33 = vmul.f32 0.7978846, %v787_v3  ;;  %v726_v17 = vmul.f32 %v694_v26, %v1710_v19  ;;  %v709_v39 = vmul.f32 %v677_v31, %v1713_v20  ;;  %v1730_v47 = vadd.f32 %v1511_v38, %v590_v13 }
 0x117   : > { %v1248_v34 = vpop.eup %1247  ;;  %930 = vst [vmem:[%s1632_s29 + $0x38] sm:$0xff] %v898_v28  ;;  %v774_v37 = vadd.f32 %v742_v30, %v1699_v4  ;;  %v577_v22 = vmul.f32 %v1142_v27, %v1506_v36  ;;  %v914_v42 = vmul.f32 %v882_v32, %v658_v23  ;;  %v657_v49 = vmul.f32 0.5, %v1646_v6  ;;  %v1169_v23 = vpop.f32.mrf.mxu1 }
 0x118   : > { %v865_v43 = vadd.f32 1.0, %v1248_v34  ;;  %1257 = vtanh.f32 %v819_v33  ;;  %v758_v48 = vmul.f32 0.044715, %v726_v17  ;;  %v741_v51 = vmul.f32 0.044715, %v709_v39 }
 0x119   : > { %v806_v50 = vmul.f32 0.7978846, %v774_v37  ;;  %v693_v54 = vmul.f32 %v1730_v47, %v1730_v47  ;;  %946 = vst [vmem:[%s1632_s29 + $0xb8] sm:$0xff] %v914_v42  ;;  %v1739_v59 = vadd.f32 %v1511_v38, %v577_v22  ;;  %v593_v60 = vmul.f32 %v1166_v41, %v1506_v36 }
 0x11a   : > { %v1250_v56 = vpop.eup %1249  ;;  %v897_v57 = vmul.f32 %v865_v43, %v641_v29  ;;  %v790_v58 = vadd.f32 %v758_v48, %v1710_v19  ;;  %v773_v6 = vadd.f32 %v741_v51, %v1713_v20  ;;  %v644_v63 = vmul.f32 0.5, %v1657_v9 }
 0x11b   : > { %v881_v61 = vadd.f32 1.0, %v1250_v56  ;;  %1259 = vtanh.f32 %v806_v50  ;;  %v725_v62 = vmul.f32 %v693_v54, %v1730_v47  ;;  %v680_v0 = vmul.f32 %v1739_v59, %v1739_v59  ;;  %v548_v50 = vpop.f32.mrf.mxu1 }
 0x11c   : > { %929 = vst [vmem:[%s1632_s29 + $0x30] sm:$0xff] %v897_v57  ;;  %v822_v44 = vmul.f32 0.7978846, %v790_v58  ;;  %v1749_v52 = vadd.f32 %v1511_v38, %v593_v60  ;;  %v805_v7 = vmul.f32 0.7978846, %v773_v6  ;;  %v576_v10 = vmul.f32 %v1506_v36, %v458_v55 }
 0x11d   : > { %v1252_v45 = vpop.eup %1251  ;;  %v913_v5 = vmul.f32 %v881_v61, %v657_v49  ;;  %v757_v8 = vmul.f32 0.044715, %v725_v62  ;;  %v660_v15 = vmul.f32 0.5, %v1669_v25  ;;  %v712_v9 = vmul.f32 %v680_v0, %v1739_v59  ;;  %v468_v49 = vpop.f32.mrf.mxu0 }
 0x11e   : > { %v868_v14 = vadd.f32 1.0, %v1252_v45  ;;  %1261 = vtanh.f32 %v822_v44  ;;  %v696_v53 = vmul.f32 %v1749_v52, %v1749_v52  ;;  %v1759_v16 = vadd.f32 %v1511_v38, %v576_v10 }
 0x11f   : > { %945 = vst [vmem:[%s1632_s29 + $0xb0] sm:$0xff] %v913_v5  ;;  %1263 = vtanh.f32 %v805_v7  ;;  %v789_v11 = vadd.f32 %v757_v8, %v1730_v47  ;;  %v744_v21 = vmul.f32 0.044715, %v712_v9  ;;  %v592_v13 = vmul.f32 %v1506_v36, %v538_v1 }
 0x120   : > { %v1254_v18 = vpop.eup %1253  ;;  %v900_v2 = vmul.f32 %v868_v14, %v644_v63  ;;  %v579_v25 = vmul.f32 %v1145_v12, %v1506_v36  ;;  %v643_v3 = vmul.f32 0.5, %v1681_v35  ;;  %v728_v27 = vmul.f32 %v696_v53, %v1749_v52 }
 0x121   : > { %v884_v24 = vadd.f32 1.0, %v1254_v18  ;;  %v821_v26 = vmul.f32 0.7978846, %v789_v11  ;;  %v776_v46 = vadd.f32 %v744_v21, %v1739_v59  ;;  %v679_v28 = vmul.f32 %v1759_v16, %v1759_v16 }
 0x122   : > { %932 = vst [vmem:[%s1632_s29 + $0x48] sm:$0xff] %v900_v2  ;;  %v1770_v29 = vadd.f32 %v1511_v38, %v592_v13  ;;  %v1773_v30 = vadd.f32 %v1511_v38, %v579_v25  ;;  %v1256_v31 = vpop.eup %1255  ;;  %v760_v35 = vmul.f32 0.044715, %v728_v27  ;;  %v595_v33 = vmul.f32 %v1169_v23, %v1506_v36 }
 0x123   : > { %v916_v32 = vmul.f32 %v884_v24, %v660_v15  ;;  %1265 = vtanh.f32 %v821_v26  ;;  %v867_v17 = vadd.f32 1.0, %v1256_v31  ;;  %v659_v34 = vmul.f32 0.5, %v1684_v40 }
 0x124   : > { %v808_v37 = vmul.f32 0.7978846, %v776_v46  ;;  %v711_v39 = vmul.f32 %v679_v28, %v1759_v16  ;;  %v646_v41 = vmul.f32 0.5, %v1699_v4  ;;  %v792_v42 = vadd.f32 %v760_v35, %v1749_v52 }
 0x125   : > { %v1258_v22 = vpop.eup %1257  ;;  %948 = vst [vmem:[%s1632_s29 + $0xc8] sm:$0xff] %v916_v32  ;;  %v695_v43 = vmul.f32 %v1770_v29, %v1770_v29  ;;  %v682_v48 = vmul.f32 %v1773_v30, %v1773_v30  ;;  %v899_v51 = vmul.f32 %v867_v17, %v643_v3  ;;  %v1788_v57 = vadd.f32 %v1511_v38, %v595_v33 }
 0x126   : > { %v883_v40 = vadd.f32 1.0, %v1258_v22  ;;  %1267 = vtanh.f32 %v808_v37  ;;  %v743_v54 = vmul.f32 0.044715, %v711_v39  ;;  %v824_v55 = vmul.f32 0.7978846, %v792_v42 }
 0x127   : > { %v727_v56 = vmul.f32 %v695_v43, %v1770_v29  ;;  %v714_v4 = vmul.f32 %v682_v48, %v1773_v30  ;;  %931 = vst [vmem:[%s1632_s29 + $0x40] sm:$0xff] %v899_v51  ;;  %v578_v6 = vmul.f32 %v1506_v36, %v468_v49  ;;  %v594_v62 = vmul.f32 %v1506_v36, %v548_v50 }
 0x128   : > { %v1260_v58 = vpop.eup %1259  ;;  %v915_v60 = vmul.f32 %v883_v40, %v659_v34  ;;  %v775_v61 = vadd.f32 %v743_v54, %v1759_v16  ;;  %1269 = vtanh.f32 %v824_v55  ;;  %v662_v1 = vmul.f32 0.5, %v1710_v19 }
 0x129   : > { %v870_v63 = vadd.f32 1.0, %v1260_v58  ;;  %v759_v44 = vmul.f32 0.044715, %v727_v56  ;;  %v746_v0 = vmul.f32 0.044715, %v714_v4  ;;  %v698_v5 = vmul.f32 %v1788_v57, %v1788_v57 }
 0x12a   : > { %947 = vst [vmem:[%s1632_s29 + $0xc0] sm:$0xff] %v915_v60  ;;  %v807_v45 = vmul.f32 0.7978846, %v775_v61  ;;  %v1799_v7 = vadd.f32 %v1511_v38, %v578_v6  ;;  %v1804_v14 = vadd.f32 %v1511_v38, %v594_v62  ;;  %v645_v19 = vmul.f32 0.5, %v1713_v20 }
 0x12b   : > { %v1262_v8 = vpop.eup %1261  ;;  %v902_v10 = vmul.f32 %v870_v63, %v646_v41  ;;  %v791_v12 = vadd.f32 %v759_v44, %v1770_v29  ;;  %v778_v36 = vadd.f32 %v746_v0, %v1773_v30  ;;  %v730_v11 = vmul.f32 %v698_v5, %v1788_v57 }
 0x12c   : > { %v1264_v15 = vpop.eup %1263  ;;  %v886_v9 = vadd.f32 1.0, %v1262_v8  ;;  %1271 = vtanh.f32 %v807_v45  ;;  %v681_v21 = vmul.f32 %v1799_v7, %v1799_v7  ;;  %v697_v38 = vmul.f32 %v1804_v14, %v1804_v14 }
 0x12d   : > { %934 = vst [vmem:[%s1632_s29 + $0x58] sm:$0xff] %v902_v10  ;;  %v869_v53 = vadd.f32 1.0, %v1264_v15  ;;  %v823_v18 = vmul.f32 0.7978846, %v791_v12  ;;  %v810_v2 = vmul.f32 0.7978846, %v778_v36 }
 0x12e   : > { %v918_v13 = vmul.f32 %v886_v9, %v662_v1  ;;  %v762_v25 = vmul.f32 0.044715, %v730_v11  ;;  %v713_v20 = vmul.f32 %v681_v21, %v1799_v7  ;;  %v729_v26 = vmul.f32 %v697_v38, %v1804_v14 }
 0x12f   : > { %v901_v23 = vmul.f32 %v869_v53, %v645_v19  ;;  %1273 = vtanh.f32 %v823_v18  ;;  %v661_v27 = vmul.f32 0.5, %v1730_v47  ;;  %v648_v34 = vmul.f32 0.5, %v1739_v59 }
 0x130   : > { %v1266_v24 = vpop.eup %1265  ;;  %950 = vst [vmem:[%s1632_s29 + $0xd8] sm:$0xff] %v918_v13  ;;  %1275 = vtanh.f32 %v810_v2  ;;  %v794_v3 = vadd.f32 %v762_v25, %v1788_v57  ;;  %v745_v28 = vmul.f32 0.044715, %v713_v20  ;;  %v761_v32 = vmul.f32 0.044715, %v729_v26 }
 0x131   : > { %933 = vst [vmem:[%s1632_s29 + $0x50] sm:$0xff] %v901_v23  ;;  %v885_v46 = vadd.f32 1.0, %v1266_v24  ;;  %v664_v43 = vmul.f32 0.5, %v1749_v52  ;;  %v647_v50 = vmul.f32 0.5, %v1759_v16  ;;  %v663_v56 = vmul.f32 0.5, %v1770_v29 }
 0x132   : > { %v826_v31 = vmul.f32 0.7978846, %v794_v3  ;;  %v777_v17 = vadd.f32 %v745_v28, %v1799_v7  ;;  %v793_v39 = vadd.f32 %v761_v32, %v1804_v14  ;;  %v650_v4 = vmul.f32 0.5, %v1773_v30 }
 0x133   : > { %v1268_v35 = vpop.eup %1267  ;;  %v917_v33 = vmul.f32 %v885_v46, %v661_v27  ;;  %v666_v16 = vmul.f32 0.5, %v1788_v57  ;;  %v649_v30 = vmul.f32 0.5, %v1799_v7  ;;  %v665_v1 = vmul.f32 0.5, %v1804_v14 }
 0x134   : > { %v872_v37 = vadd.f32 1.0, %v1268_v35  ;;  %1277 = vtanh.f32 %v826_v31  ;;  %v809_v22 = vmul.f32 0.7978846, %v777_v17  ;;  %v825_v42 = vmul.f32 0.7978846, %v793_v39 }
 0x135   : > { %949 = vst [vmem:[%s1632_s29 + $0xd0] sm:$0xff] %v917_v33  ;;  %v1270_v41 = vpop.eup %1269 }
 0x136   : > { %v904_v47 = vmul.f32 %v872_v37, %v648_v34  ;;  %v888_v48 = vadd.f32 1.0, %v1270_v41  ;;  %1279 = vtanh.f32 %v809_v22 }
 0x137   : > { %1281 = vtanh.f32 %v825_v42 }
 0x138   : > { %936 = vst [vmem:[%s1632_s29 + $0x68] sm:$0xff] %v904_v47  ;;  %v920_v59 = vmul.f32 %v888_v48, %v664_v43 }
 0x139   : > { %v1272_v49 = vpop.eup %1271 }
 0x13a   : > { %v871_v51 = vadd.f32 1.0, %v1272_v49  ;;  %952 = vst [vmem:[%s1632_s29 + $0xe8] sm:$0xff] %v920_v59 }
 0x13c   : > { %v1274_v40 = vpop.eup %1273  ;;  %v903_v54 = vmul.f32 %v871_v51, %v647_v50 }
 0x13d   : > { %v1276_v55 = vpop.eup %1275  ;;  %v887_v52 = vadd.f32 1.0, %v1274_v40 }
 0x13e   : > { %935 = vst [vmem:[%s1632_s29 + $0x60] sm:$0xff] %v903_v54  ;;  %v874_v58 = vadd.f32 1.0, %v1276_v55 }
 0x13f   : > { %v919_v60 = vmul.f32 %v887_v52, %v663_v56 }
 0x140   : > { %v906_v61 = vmul.f32 %v874_v58, %v650_v4 }
 0x141   : > { %v1278_v6 = vpop.eup %1277  ;;  %951 = vst [vmem:[%s1632_s29 + $0xe0] sm:$0xff] %v919_v60 }
 0x142   : > { %938 = vst [vmem:[%s1632_s29 + $0x78] sm:$0xff] %v906_v61  ;;  %v890_v62 = vadd.f32 1.0, %v1278_v6 }
 0x143   : > { %v1280_v63 = vpop.eup %1279 }
 0x144   : > { %v922_v44 = vmul.f32 %v890_v62, %v666_v16  ;;  %v1282_v29 = vpop.eup %1281  ;;  %v873_v0 = vadd.f32 1.0, %v1280_v63 }
 0x145   : > { %v889_v45 = vadd.f32 1.0, %v1282_v29 }
 0x146   : > { %954 = vst [vmem:[%s1632_s29 + $0xf8] sm:$0xff] %v922_v44  ;;  %v905_v5 = vmul.f32 %v873_v0, %v649_v30 }
 0x147   : > { %v921_v57 = vmul.f32 %v889_v45, %v665_v1 }
 0x148   : > { %937 = vst [vmem:[%s1632_s29 + $0x70] sm:$0xff] %v905_v5 }
 0x149   : > { %953 = vst [vmem:[%s1632_s29 + $0xf0] sm:$0xff] %v921_v57 }
 0x14a   : > { %1296 = shalt.err (!%p1293_p3)
}
 0x14b   : > { %s1297_s13 = scalar_lea.hbm %s1841_s8, 4096  ;;  %s1301_s22 = scalar_lea.hbm %s1893_s4, 8192 }
 0x14c   : > { %p1298_p4 = scmp.ne.s32.totalorder %s1841_s8, %s1297_s13  ;;  %p1302_p9 = scmp.lt.s32.totalorder %s1841_s8, %s1893_s4 }
 0x14d   : > { %p1303_p10 = scmp.lt.s32.totalorder %s1301_s22, %s1297_s13 }
 0x14e   : > { %p1299_p7 = pnand %p1298_p4, %p1411_p5 }
 0x14f   : > { %p1304_p11 = por %p1303_p10, %p1302_p9 }
 0x150   : > { %p1300_p8 = pneg %p1299_p7 }
 0x152   : > { %p1305_p12 = pnand %p1304_p11, %p1300_p8 }
 0x154   : > { %1308 = shalt.err (!%p1305_p12)
}
 0x155   : > { %s1346_s28 = smov 128   ;;  %s1347_s29 = smov 8  }
 0x156   : > { %1178 = dma.vmem_to_hbm [thread:$0]  (%p1411_p5), %s1843_s5, 4096, %s1841_s8, %s1849_s19, %s1346_s28, %s1346_s28, %s1347_s29  }
 0x157 PF: > { %p1184_p13 = scmp.ge.s32.totalorder %s1343_s18, 2  ;;  %s984_s30 = sand.u32 1, %s1331_s15  }
 0x158   : > { %s985_s6 = scalar_lea.sflag [#allocation3], %s984_s30 }
 0x159   : > { %p1181_p0 = pnand %p1184_p13, %p1415_p6 }
 0x15b   : > { %p1182_p1 = pneg %p1181_p0 }
 0x15d   : > { %1326 = dma.done.wait (%p1182_p1), %s985_s6, 4096  }
 0x15e   : > { %1328 = vsyncadd (%p1182_p1), %s985_s6, 4294963200  ;;  %p14_p2 = scmp.ge.s32.totalorder %s1398_s21, 4   ;;  %s1896_s15 = smov %s1335_s16 }
 0x15f   : > { %s1897_s16 = smov %s1339_s17  ;;  %s1898_s17 = smov %s1409_s24 }
 0x160   : > { %s1899_s18 = smov %s1398_s21  ;;  %16 = sbr.rel (!%p14_p2) target bundleno = 3 (0x3), region = 71 }
 0x165   :  { %990 = vsyncpa [#allocation3], 1 }
 0x166   :  { %992 = vsyncpa [#allocation3 + $0x1], 1 }

</bundles_post_ra>
